<compile_context>
chip_gen: v5e
topology: v5e:2x2
jax: 0.10.0
libtpu: 0.0.40
codegen_flags: <defaults>
</compile_context>

<pallas_src>
import functools

import jax
import jax.numpy as jnp
from jax import lax
from jax.experimental import pallas as pl
from jax.experimental.pallas import tpu as pltpu

NUM_FEAT = 1000   # resnet50 output width
NUM_OUT = 10      # fc_add output width
DROP_P = 0.5      # nn.Dropout(0.5), training mode (inverted dropout)


def _keep_mask(seed_i32, row0_i32, shape, keep_prob):
    """Bernoulli(keep_prob) mask from a counter-based hash PRNG (lowbias32).

    Uses only plain jnp/lax integer ops so it lowers both on Mosaic TPU and in
    interpret mode.  Keyed on the *global* element index, so the mask is
    independent of the tile size and distinct across grid tiles.
    """
    rows = lax.broadcasted_iota(jnp.uint32, shape, 0)
    cols = lax.broadcasted_iota(jnp.uint32, shape, 1)
    gidx = (row0_i32.astype(jnp.uint32) + rows) * jnp.uint32(shape[1]) + cols
    h = gidx ^ seed_i32.astype(jnp.uint32)
    h = h ^ (h >> jnp.uint32(16))
    h = h * jnp.uint32(0x7FEB352D)
    h = h ^ (h >> jnp.uint32(15))
    h = h * jnp.uint32(0x846CA68B)
    h = h ^ (h >> jnp.uint32(16))
    # Compare the top 24 random bits against the keep threshold (int32-safe).
    thresh = jnp.int32(int(round(keep_prob * (1 << 24))))
    return (h >> jnp.uint32(8)).astype(jnp.int32) < thresh


def head_kernel(seed_ref, feat_ref, add_ref, wf_ref, wa_ref, b_ref, out_ref,
                *, training):
    # --- ReLU (cast in-kernel; feat may arrive as bf16 or f32) -------------
    act = jnp.maximum(feat_ref[...].astype(jnp.float32), 0.0)

    # --- Dropout(p=0.5): 0/1 keep mask only (scale folded into wf) ---------
    if training:
        tb = feat_ref.shape[0]
        row0 = pl.program_id(0) * tb
        keep = _keep_mask(seed_ref[0], row0, act.shape, 1.0 - DROP_P)
        act = jnp.where(keep, act, 0.0)

    # --- Linear(1001 -> 10) on the implicit concat --------------------------
    # [act | add] @ W + b  ==  act @ W[:1000] + add * W[1000] + b
    y = jnp.dot(act, wf_ref[...], preferred_element_type=jnp.float32)  # (TB, 10)
    y = y + add_ref[...] * wa_ref[...] + b_ref[...]                    # (TB,1)*(1,10)+(1,10)

    # --- Softmax(dim=1) ------------------------------------------------------
    m = jnp.max(y, axis=1, keepdims=True)
    e = jnp.exp(y - m)
    out_ref[...] = e / jnp.sum(e, axis=1, keepdims=True)


def model_head(feat, add_variable, w_full, bias, seed, *, training=True,
               block_b=512):
    """feat: (B, 1000) backbone output; add_variable: (B,); w_full: (1001, 10)."""
    B, F = feat.shape
    assert F == NUM_FEAT
    # Tile rows: full batch if small, else block_b (multiple of 8).
    TB = B if B <= block_b else block_b

    # Fold the inverted-dropout scale into the feature weights (one-time).
    scale = 1.0 / (1.0 - DROP_P) if training else 1.0
    w_feat = (w_full[:NUM_FEAT, :] * scale).astype(jnp.float32)   # (1000, 10)
    w_add = w_full[NUM_FEAT:, :].astype(jnp.float32)              # (1, 10)
    b2d = bias.reshape(1, NUM_OUT).astype(jnp.float32)            # (1, 10)
    add2d = add_variable.reshape(B, 1).astype(jnp.float32)        # (B, 1)
    seed_arr = jnp.asarray([seed], dtype=jnp.int32)

    kernel = functools.partial(head_kernel, training=training)

    return pl.pallas_call(
        kernel,
        grid=(pl.cdiv(B, TB),),
        out_shape=jax.ShapeDtypeStruct((B, NUM_OUT), jnp.float32),
        in_specs=[
            pl.BlockSpec(memory_space=pltpu.MemorySpace.SMEM),        # seed (scalar)
            pl.BlockSpec((TB, NUM_FEAT), lambda i: (i, 0)),           # feat tile
            pl.BlockSpec((TB, 1), lambda i: (i, 0)),                  # add tile
            pl.BlockSpec((NUM_FEAT, NUM_OUT), lambda i: (0, 0)),      # W[:1000] (resident)
            pl.BlockSpec((1, NUM_OUT), lambda i: (0, 0)),             # W[1000]  (resident)
            pl.BlockSpec((1, NUM_OUT), lambda i: (0, 0)),             # bias     (resident)
        ],
        out_specs=pl.BlockSpec((TB, NUM_OUT), lambda i: (i, 0)),
        compiler_params=pltpu.CompilerParams(
            dimension_semantics=("parallel",),                        # megacore on v7x
        ),
    )(seed_arr, feat, add2d, w_feat, w_add, b2d)


if __name__ == "__main__":
    key = jax.random.PRNGKey(0)
    k_feat, k_add, k_w, k_b = jax.random.split(key, 4)

    B = 2
    # (B, 1000) stands in for resnet50(x) applied to an NCHW image batch.
    feat = jax.random.normal(k_feat, (B, NUM_FEAT), dtype=jnp.float32)
    add_variable = jax.random.normal(k_add, (B,), dtype=jnp.float32)

    # Deterministic fc_add parameters (PyTorch Linear weight is (10, 1001);
    # stored transposed as (1001, 10) so the kernel computes x @ W + b).
    w_full = 0.02 * jax.random.normal(k_w, (NUM_FEAT + 1, NUM_OUT), dtype=jnp.float32)
    bias = 0.01 * jax.random.normal(k_b, (NUM_OUT,), dtype=jnp.float32)

    out = model_head(feat, add_variable, w_full, bias, seed=1234, training=True)
    out = jax.block_until_ready(out)

    assert out.shape == (B, NUM_OUT)
    assert bool(jnp.all(jnp.isfinite(out)))
    # softmax rows must sum to 1
    assert bool(jnp.allclose(jnp.sum(out, axis=1), 1.0, atol=1e-5))
    print("KERNEL_OK")
</pallas_src>

<mosaic_0001>
module attributes {stable_mosaic.version = 11 : i64} {
  func.func @head_kernel(%arg0: i32, %arg1: memref<1xi32, #tpu.memory_space<smem>>, %arg2: memref<2x1000xf32, #tpu.memory_space<vmem>>, %arg3: memref<2x1xf32, #tpu.memory_space<vmem>>, %arg4: memref<1000x10xf32, #tpu.memory_space<vmem>>, %arg5: memref<1x10xf32, #tpu.memory_space<vmem>>, %arg6: memref<1x10xf32, #tpu.memory_space<vmem>>, %arg7: memref<2x10xf32, #tpu.memory_space<vmem>>) attributes {dimension_semantics = [#tpu.dimension_semantics<parallel>], iteration_bounds = array<i64: 1>, scalar_prefetch = 0 : i64, scratch_operands = 0 : i64, tpu.core_type = #tpu.core_type<tc>, window_params = [{transform_indices = @transform_0, window_bounds = array<i64: 1>}, {transform_indices = @transform_1, window_bounds = array<i64: 2, 1000>}, {transform_indices = @transform_2, window_bounds = array<i64: 2, 1>}, {pipeline_mode = #tpu.pipeline_mode<synchronous>, transform_indices = @transform_3, window_bounds = array<i64: 1000, 10>}, {pipeline_mode = #tpu.pipeline_mode<synchronous>, transform_indices = @transform_4, window_bounds = array<i64: 1, 10>}, {pipeline_mode = #tpu.pipeline_mode<synchronous>, transform_indices = @transform_5, window_bounds = array<i64: 1, 10>}, {transform_indices = @transform_6, window_bounds = array<i64: 2, 10>}]} {
    %c0 = arith.constant 0 : index
    %c0_0 = arith.constant 0 : index
    %0 = vector.load %arg2[%c0, %c0_0] : memref<2x1000xf32, #tpu.memory_space<vmem>>, vector<2x1000xf32>
    %cst = arith.constant 0.000000e+00 : f32
    %1 = vector.broadcast %cst : f32 to vector<2x1000xf32>
    %2 = arith.maximumf %0, %1 : vector<2x1000xf32>
    %c2_i32 = arith.constant 2 : i32
    %3 = arith.muli %arg0, %c2_i32 : i32
    %c0_1 = arith.constant 0 : index
    %4 = memref.load %arg1[%c0_1] : memref<1xi32, #tpu.memory_space<smem>>
    %5 = tpu.iota {dimensions = array<i32: 0>} : vector<2x1000xi32>
    %6 = tpu.iota {dimensions = array<i32: 1>} : vector<2x1000xi32>
    %7 = vector.broadcast %3 : i32 to vector<2x1000xi32>
    %8 = arith.addi %7, %5 : vector<2x1000xi32>
    %c1000_i32 = arith.constant 1000 : i32
    %9 = vector.broadcast %c1000_i32 : i32 to vector<2x1000xi32>
    %10 = arith.muli %8, %9 : vector<2x1000xi32>
    %11 = arith.addi %10, %6 : vector<2x1000xi32>
    %12 = vector.broadcast %4 : i32 to vector<2x1000xi32>
    %13 = arith.xori %11, %12 : vector<2x1000xi32>
    %c16_i32 = arith.constant 16 : i32
    %14 = vector.broadcast %c16_i32 : i32 to vector<2x1000xi32>
    %15 = arith.shrui %13, %14 : vector<2x1000xi32>
    %16 = arith.xori %13, %15 : vector<2x1000xi32>
    %c2146121005_i32 = arith.constant 2146121005 : i32
    %17 = vector.broadcast %c2146121005_i32 : i32 to vector<2x1000xi32>
    %18 = arith.muli %16, %17 : vector<2x1000xi32>
    %c15_i32 = arith.constant 15 : i32
    %19 = vector.broadcast %c15_i32 : i32 to vector<2x1000xi32>
    %20 = arith.shrui %18, %19 : vector<2x1000xi32>
    %21 = arith.xori %18, %20 : vector<2x1000xi32>
    %c-2073254261_i32 = arith.constant -2073254261 : i32
    %22 = vector.broadcast %c-2073254261_i32 : i32 to vector<2x1000xi32>
    %23 = arith.muli %21, %22 : vector<2x1000xi32>
    %c16_i32_2 = arith.constant 16 : i32
    %24 = vector.broadcast %c16_i32_2 : i32 to vector<2x1000xi32>
    %25 = arith.shrui %23, %24 : vector<2x1000xi32>
    %26 = arith.xori %23, %25 : vector<2x1000xi32>
    %c8_i32 = arith.constant 8 : i32
    %27 = vector.broadcast %c8_i32 : i32 to vector<2x1000xi32>
    %28 = arith.shrui %26, %27 : vector<2x1000xi32>
    %c8388608_i32 = arith.constant 8388608 : i32
    %29 = vector.broadcast %c8388608_i32 : i32 to vector<2x1000xi32>
    %30 = arith.cmpi slt, %28, %29 : vector<2x1000xi32>
    %cst_3 = arith.constant 0.000000e+00 : f32
    %31 = vector.broadcast %cst_3 : f32 to vector<2x1000xf32>
    %32 = arith.select %30, %2, %31 : vector<2x1000xi1>, vector<2x1000xf32>
    %c0_4 = arith.constant 0 : index
    %c0_5 = arith.constant 0 : index
    %33 = vector.load %arg4[%c0_4, %c0_5] : memref<1000x10xf32, #tpu.memory_space<vmem>>, vector<1000x10xf32>
    %cst_6 = arith.constant dense<0.000000e+00> : vector<2x10xf32>
    %34 = tpu.matmul %32, %33, %cst_6 {dimension_numbers = #tpu.dot_dimension_numbers<[1], [0], [0], [1], [0, 0, 1, 1], [], []>} : vector<2x1000xf32>, vector<1000x10xf32>, vector<2x10xf32> -> vector<2x10xf32>
    %c0_7 = arith.constant 0 : index
    %c0_8 = arith.constant 0 : index
    %35 = vector.load %arg3[%c0_7, %c0_8] : memref<2x1xf32, #tpu.memory_space<vmem>>, vector<2x1xf32>
    %c0_9 = arith.constant 0 : index
    %c0_10 = arith.constant 0 : index
    %36 = vector.load %arg5[%c0_9, %c0_10] : memref<1x10xf32, #tpu.memory_space<vmem>>, vector<1x10xf32>
    %37 = vector.broadcast %35 : vector<2x1xf32> to vector<2x10xf32>
    %38 = vector.broadcast %36 : vector<1x10xf32> to vector<2x10xf32>
    %39 = arith.mulf %37, %38 : vector<2x10xf32>
    %40 = arith.addf %34, %39 : vector<2x10xf32>
    %c0_11 = arith.constant 0 : index
    %c0_12 = arith.constant 0 : index
    %41 = vector.load %arg6[%c0_11, %c0_12] : memref<1x10xf32, #tpu.memory_space<vmem>>, vector<1x10xf32>
    %42 = vector.broadcast %41 : vector<1x10xf32> to vector<2x10xf32>
    %43 = arith.addf %40, %42 : vector<2x10xf32>
    %cst_13 = arith.constant dense<0xFF800000> : vector<2xf32>
    %44 = vector.multi_reduction <maximumf>, %43, %cst_13 [1] : vector<2x10xf32> to vector<2xf32>
    %45 = vector.shape_cast %44 : vector<2xf32> to vector<2x1xf32>
    %46 = vector.broadcast %45 : vector<2x1xf32> to vector<2x10xf32>
    %47 = arith.subf %43, %46 : vector<2x10xf32>
    %48 = math.exp %47 : vector<2x10xf32>
    %cst_14 = arith.constant dense<0.000000e+00> : vector<2xf32>
    %49 = vector.multi_reduction <add>, %48, %cst_14 [1] : vector<2x10xf32> to vector<2xf32>
    %50 = vector.shape_cast %49 : vector<2xf32> to vector<2x1xf32>
    %51 = vector.broadcast %50 : vector<2x1xf32> to vector<2x10xf32>
    %52 = arith.divf %48, %51 : vector<2x10xf32>
    %c0_15 = arith.constant 0 : index
    %c0_16 = arith.constant 0 : index
    %53 = vector.load %arg7[%c0_15, %c0_16] : memref<2x10xf32, #tpu.memory_space<vmem>>, vector<2x10xf32>
    tpu.vector_store %arg7[%c0_15, %c0_16], %52 {strides = array<i32>} : memref<2x10xf32, #tpu.memory_space<vmem>>, vector<2x10xf32>,
    return
  }
  func.func @transform_0(%arg0: i32) -> i32 {
    %c0_i32 = arith.constant 0 : i32
    %c0_i32_0 = arith.constant 0 : i32
    return %c0_i32 : i32
  }
  func.func @transform_1(%arg0: i32) -> (i32, i32) {
    %c0_i32 = arith.constant 0 : i32
    %c0_i32_0 = arith.constant 0 : i32
    return %arg0, %c0_i32 : i32, i32
  }
  func.func @transform_2(%arg0: i32) -> (i32, i32) {
    %c0_i32 = arith.constant 0 : i32
    %c0_i32_0 = arith.constant 0 : i32
    return %arg0, %c0_i32 : i32, i32
  }
  func.func @transform_3(%arg0: i32) -> (i32, i32) {
    %c0_i32 = arith.constant 0 : i32
    %c0_i32_0 = arith.constant 0 : i32
    %c0_i32_1 = arith.constant 0 : i32
    return %c0_i32, %c0_i32_0 : i32, i32
  }
  func.func @transform_4(%arg0: i32) -> (i32, i32) {
    %c0_i32 = arith.constant 0 : i32
    %c0_i32_0 = arith.constant 0 : i32
    %c0_i32_1 = arith.constant 0 : i32
    return %c0_i32, %c0_i32_0 : i32, i32
  }
  func.func @transform_5(%arg0: i32) -> (i32, i32) {
    %c0_i32 = arith.constant 0 : i32
    %c0_i32_0 = arith.constant 0 : i32
    %c0_i32_1 = arith.constant 0 : i32
    return %c0_i32, %c0_i32_0 : i32, i32
  }
  func.func @transform_6(%arg0: i32) -> (i32, i32) {
    %c0_i32 = arith.constant 0 : i32
    %c0_i32_0 = arith.constant 0 : i32
    return %arg0, %c0_i32 : i32, i32
  }
}

</mosaic_0001>

<bundles_post_ra>
// kernel: tpu_custom_call.1
= control target key start
LH: loop header
LB: loop body
LE: loop exit
PB: predicated region body
PF: predicated region fallthrough
CT: control target
= control target key end

     0   :  { %v31_v3 = vlaneseq  ;;  %s1109_s0 = inlined_call_operand.<no memory space> [shape: s32[1], index: 0, kind: input, shape index: {}]   ;;  %s1110_s1 = inlined_call_operand.vmem [shape: f32[2,1000], index: 1, kind: input, shape index: {}]   ;;  %s1111_s2 = inlined_call_operand.vmem [shape: f32[2,1], index: 2, kind: input, shape index: {}]   ;;  %s1112_s3 = inlined_call_operand.vmem [shape: f32[1000,10], index: 3, kind: input, shape index: {}]   ;;  %s1113_s4 = inlined_call_operand.vmem [shape: f32[1,10], index: 4, kind: input, shape index: {}]   ;;  %s1114_s5 = inlined_call_operand.vmem [shape: f32[1,10], index: 5, kind: input, shape index: {}]   ;;  %s1115_s6 = inlined_call_operand.hbm [shape: f32[2,10], index: 6, kind: output, shape index: {}]  }
   0x1   :  { %v218_v0 = vld [vmem:[%s1112_s3 + $0x178] sm:$0xff]  ;;  %v217_v2 = vld [vmem:[%s1112_s3 + $0x170] sm:$0xff]  ;;  %v216_v6 = vld [vmem:[%s1112_s3 + $0x168] sm:$0xff]  ;;  %v662_v25 = vstv %s1109_s0 }
   0x2   :  { %v186_v1 = vld [vmem:[%s1112_s3 + $0x78] sm:$0xff]  ;;  %351 = vmatpush.msra.mxu2 %v218_v0  ;;  %v185_v4 = vld [vmem:[%s1112_s3 + $0x70] sm:$0xff]  ;;  %v184_v7 = vld [vmem:[%s1112_s3 + $0x68] sm:$0xff]  ;;  %v32_v9 = vshrl.u32 %v31_v3, 7  ;;  %v622_v10 = vand.u32 127, %v31_v3 }
   0x3   :  { %311 = vmatpush.msra.mxu0 %v186_v1  ;;  %v202_v5 = vld [vmem:[%s1112_s3 + $0xf8] sm:$0xff]  ;;  %v201_v8 = vld [vmem:[%s1112_s3 + $0xf0] sm:$0xff]  ;;  %v200_v11 = vld [vmem:[%s1112_s3 + $0xe8] sm:$0xff] }
   0x4   :  { %331 = vmatpush.msra.mxu1 %v202_v5  ;;  %352 = vmatpush.msra.mxu2 %v217_v2  ;;  %v215_v12 = vld [vmem:[%s1112_s3 + $0x160] sm:$0xff]  ;;  %v234_v14 = vld [vmem:[%s1112_s3 + $0x1f8] sm:$0xff]  ;;  %v36_v15 = vadd.s32 256, %v622_v10  ;;  %v637_v16 = vmul.u32 1000, %v32_v9  ;;  %v233_v18 = vld [vmem:[%s1112_s3 + $0x1f0] sm:$0xff]  ;;  %v37_v19 = vadd.s32 384, %v622_v10 }
   0x5   :  { %312 = vmatpush.msra.mxu0 %v185_v4  ;;  %v183_v13 = vld [vmem:[%s1112_s3 + $0x60] sm:$0xff]  ;;  %v214_v20 = vld [vmem:[%s1112_s3 + $0x158] sm:$0xff]  ;;  %371 = vmatpush.msra.mxu3 %v234_v14  ;;  %v232_v24 = vld [vmem:[%s1112_s3 + $0x1e8] sm:$0xff]  ;;  %v35_v29 = vadd.s32 128, %v622_v10  ;;  %v40_v36 = vadd.s32 768, %v622_v10  ;;  %v41_v43 = vadd.s32 896, %v622_v10 }
   0x6   :  { %332 = vmatpush.msra.mxu1 %v201_v8  ;;  %353 = vmatpush.msra.mxu2 %v216_v6  ;;  %v199_v17 = vld [vmem:[%s1112_s3 + $0xe0] sm:$0xff]  ;;  %v182_v21 = vld [vmem:[%s1112_s3 + $0x58] sm:$0xff]  ;;  %v47_v22 = vadd.s32 %v637_v16, %v36_v15  ;;  %v45_v26 = vadd.s32 %v637_v16, %v622_v10  ;;  %v213_v27 = vld [vmem:[%s1112_s3 + $0x150] sm:$0xff]  ;;  %v48_v32 = vadd.s32 %v637_v16, %v37_v19  ;;  %v38_v57 = vadd.s32 512, %v622_v10 }
   0x7   :  { %313 = vmatpush.msra.mxu0 %v184_v7  ;;  %v198_v23 = vld [vmem:[%s1112_s3 + $0xd8] sm:$0xff]  ;;  %372 = vmatpush.msra.mxu3 %v233_v18  ;;  %v181_v28 = vld [vmem:[%s1112_s3 + $0x50] sm:$0xff]  ;;  %v231_v31 = vld [vmem:[%s1112_s3 + $0x1e0] sm:$0xff]  ;;  %v46_v42 = vadd.s32 %v637_v16, %v35_v29  ;;  %v51_v50 = vadd.s32 %v637_v16, %v40_v36  ;;  %v52_v58 = vadd.s32 %v637_v16, %v41_v43  ;;  %v39_v62 = vadd.s32 640, %v622_v10 }
   0x8   :  { %333 = vmatpush.msra.mxu1 %v200_v11  ;;  %354 = vmatpush.msra.mxu2 %v215_v12  ;;  %v197_v30 = vld [vmem:[%s1112_s3 + $0xd0] sm:$0xff]  ;;  %v212_v33 = vld [vmem:[%s1112_s3 + $0x148] sm:$0xff]  ;;  %v56_v35 = vxor.u32 %v662_v25, %v47_v22  ;;  %v230_v38 = vld [vmem:[%s1112_s3 + $0x1d8] sm:$0xff]  ;;  %v54_v39 = vxor.u32 %v662_v25, %v45_v26  ;;  %v57_v46 = vxor.u32 %v662_v25, %v48_v32 }
   0x9   :  { %314 = vmatpush.msra.mxu0 %v183_v13  ;;  %373 = vmatpush.msra.mxu3 %v232_v24  ;;  %v180_v34 = vld [vmem:[%s1112_s3 + $0x48] sm:$0xff]  ;;  %v211_v40 = vld [vmem:[%s1112_s3 + $0x140] sm:$0xff]  ;;  %v229_v45 = vld [vmem:[%s1112_s3 + $0x1d0] sm:$0xff]  ;;  %v55_v56 = vxor.u32 %v662_v25, %v46_v42  ;;  %v60_v2 = vxor.u32 %v662_v25, %v51_v50  ;;  %v49_v9 = vadd.s32 %v637_v16, %v38_v57 }
   0xa   :  { %334 = vmatpush.msra.mxu1 %v199_v17  ;;  %355 = vmatpush.msra.mxu2 %v214_v20  ;;  %v196_v37 = vld [vmem:[%s1112_s3 + $0xc8] sm:$0xff]  ;;  %v179_v41 = vld [vmem:[%s1112_s3 + $0x40] sm:$0xff]  ;;  %v210_v47 = vld [vmem:[%s1112_s3 + $0x138] sm:$0xff]  ;;  %v64_v49 = vshrl.u32 %v56_v35, 16  ;;  %v62_v53 = vshrl.u32 %v54_v39, 16  ;;  %v65_v61 = vshrl.u32 %v57_v46, 16  ;;  %v61_v10 = vxor.u32 %v662_v25, %v52_v58 }
   0xb   :  { %315 = vmatpush.msra.mxu0 %v182_v21  ;;  %374 = vmatpush.msra.mxu3 %v231_v31  ;;  %v195_v44 = vld [vmem:[%s1112_s3 + $0xc0] sm:$0xff]  ;;  %v178_v48 = vld [vmem:[%s1112_s3 + $0x38] sm:$0xff]  ;;  %v228_v52 = vld [vmem:[%s1112_s3 + $0x1c8] sm:$0xff]  ;;  %v63_v8 = vshrl.u32 %v55_v56, 16  ;;  %v50_v14 = vadd.s32 %v637_v16, %v39_v62  ;;  %v68_v19 = vshrl.u32 %v60_v2, 16  ;;  %v58_v26 = vxor.u32 %v662_v25, %v49_v9 }
   0xc   :  { %335 = vmatpush.msra.mxu1 %v198_v23  ;;  %356 = vmatpush.msra.mxu2 %v213_v27  ;;  %v194_v51 = vld [vmem:[%s1112_s3 + $0xb8] sm:$0xff]  ;;  %v209_v54 = vld [vmem:[%s1112_s3 + $0x130] sm:$0xff]  ;;  %v227_v60 = vld [vmem:[%s1112_s3 + $0x1c0] sm:$0xff]  ;;  %v745_v1 = vxor.u32 %v64_v49, %v56_v35  ;;  %v754_v5 = vxor.u32 %v62_v53, %v54_v39  ;;  %v770_v13 = vxor.u32 %v65_v61, %v57_v46  ;;  %v69_v27 = vshrl.u32 %v61_v10, 16 }
   0xd   :  { %316 = vmatpush.msra.mxu0 %v181_v28  ;;  %375 = vmatpush.msra.mxu3 %v230_v38  ;;  %v177_v55 = vld [vmem:[%s1112_s3 + $0x30] sm:$0xff]  ;;  %v208_v63 = vld [vmem:[%s1112_s3 + $0x128] sm:$0xff]  ;;  %v226_v4 = vld [vmem:[%s1112_s3 + $0x1b8] sm:$0xff]  ;;  %v793_v24 = vxor.u32 %v63_v8, %v55_v56  ;;  %v59_v31 = vxor.u32 %v662_v25, %v50_v14  ;;  %v810_v35 = vxor.u32 %v68_v19, %v60_v2 }
   0xe   :  { %336 = vmatpush.msra.mxu1 %v197_v30  ;;  %357 = vmatpush.msra.mxu2 %v212_v33  ;;  %v193_v59 = vld [vmem:[%s1112_s3 + $0xb0] sm:$0xff]  ;;  %v176_v0 = vld [vmem:[%s1112_s3 + $0x28] sm:$0xff]  ;;  %v207_v6 = vld [vmem:[%s1112_s3 + $0x120] sm:$0xff]  ;;  %v80_v18 = vmul.u32 2146121005, %v745_v1  ;;  %v825_v42 = vxor.u32 %v69_v27, %v61_v10 }
   0xf   :  { %317 = vmatpush.msra.mxu0 %v180_v34  ;;  %376 = vmatpush.msra.mxu3 %v229_v45  ;;  %v192_v3 = vld [vmem:[%s1112_s3 + $0xa8] sm:$0xff]  ;;  %v175_v7 = vld [vmem:[%s1112_s3 + $0x20] sm:$0xff]  ;;  %v225_v12 = vld [vmem:[%s1112_s3 + $0x1b0] sm:$0xff]  ;;  %v78_v21 = vmul.u32 2146121005, %v754_v5  ;;  %v67_v46 = vshrl.u32 %v59_v31, 16 }
  0x10   :  { %337 = vmatpush.msra.mxu1 %v196_v37  ;;  %358 = vmatpush.msra.mxu2 %v211_v40  ;;  %v191_v11 = vld [vmem:[%s1112_s3 + $0xa0] sm:$0xff]  ;;  %v206_v15 = vld [vmem:[%s1112_s3 + $0x118] sm:$0xff]  ;;  %v224_v16 = vld [vmem:[%s1112_s3 + $0x1a8] sm:$0xff]  ;;  %v81_v30 = vmul.u32 2146121005, %v770_v13  ;;  %v88_v34 = vshrl.u32 %v80_v18, 15 }
  0x11   :  { %318 = vmatpush.msra.mxu0 %v179_v41  ;;  %377 = vmatpush.msra.mxu3 %v228_v52  ;;  %v174_v17 = vld [vmem:[%s1112_s3 + $0x18] sm:$0xff]  ;;  %v205_v22 = vld [vmem:[%s1112_s3 + $0x110] sm:$0xff]  ;;  %v223_v29 = vld [vmem:[%s1112_s3 + $0x1a0] sm:$0xff]  ;;  %v86_v37 = vshrl.u32 %v78_v21, 15  ;;  %v79_v40 = vmul.u32 2146121005, %v793_v24  ;;  %v867_v62 = vxor.u32 %v67_v46, %v59_v31 }
  0x12   :  { %338 = vmatpush.msra.mxu1 %v195_v44  ;;  %359 = vmatpush.msra.mxu2 %v210_v47  ;;  %v190_v20 = vld [vmem:[%s1112_s3 + $0x98] sm:$0xff]  ;;  %v173_v23 = vld [vmem:[%s1112_s3 + $0x10] sm:$0xff]  ;;  %v204_v32 = vld [vmem:[%s1112_s3 + $0x108] sm:$0xff]  ;;  %v66_v41 = vshrl.u32 %v58_v26, 16  ;;  %v89_v45 = vshrl.u32 %v81_v30, 15  ;;  %v839_v49 = vxor.u32 %v88_v34, %v80_v18 }
  0x13   :  { %319 = vmatpush.msra.mxu0 %v178_v48  ;;  %378 = vmatpush.msra.mxu3 %v227_v60  ;;  %v189_v28 = vld [vmem:[%s1112_s3 + $0x90] sm:$0xff]  ;;  %v172_v33 = vld [vmem:[%s1112_s3 + $0x8] sm:$0xff]  ;;  %v222_v25 = vld [vmem:[%s1112_s3 + $0x198] sm:$0xff]  ;;  %v84_v50 = vmul.u32 2146121005, %v810_v35  ;;  %v848_v53 = vxor.u32 %v86_v37, %v78_v21  ;;  %v87_v56 = vshrl.u32 %v79_v40, 15 }
  0x14   :  { %339 = vmatpush.msra.mxu1 %v194_v51  ;;  %360 = vmatpush.msra.mxu2 %v209_v54  ;;  %v188_v36 = vld [vmem:[%s1112_s3 + $0x88] sm:$0xff]  ;;  %v203_v38 = vld [vmem:[%s1112_s3 + $0x100] sm:$0xff]  ;;  %v282_v43 = vld [vmem:[%s1112_s3 + $0x378] sm:$0xff]  ;;  %v856_v57 = vxor.u32 %v66_v41, %v58_v26  ;;  %v85_v58 = vmul.u32 2146121005, %v825_v42  ;;  %v865_v61 = vxor.u32 %v89_v45, %v81_v30 }
  0x15   :  { %320 = vmatpush.msra.mxu0 %v177_v55  ;;  %379 = vmatpush.msra.mxu3 %v226_v4  ;;  %v171_v39 = vld [vmem:[%s1112_s3] sm:$0xff]  ;;  %v250_v44 = vld [vmem:[%s1112_s3 + $0x278] sm:$0xff]  ;;  %v221_v48 = vld [vmem:[%s1112_s3 + $0x190] sm:$0xff]  ;;  %v104_v1 = vmul.u32 2221713035, %v839_v49  ;;  %v92_v2 = vshrl.u32 %v84_v50, 15  ;;  %v892_v10 = vxor.u32 %v87_v56, %v79_v40 }
  0x16   :  { %340 = vmatpush.msra.mxu1 %v193_v59  ;;  %361 = vmatpush.msra.mxu2 %v208_v63  ;;  %v187_v47 = vld [vmem:[%s1112_s3 + $0x80] sm:$0xff]  ;;  %v281_v51 = vld [vmem:[%s1112_s3 + $0x370] sm:$0xff]  ;;  %v266_v54 = vld [vmem:[%s1112_s3 + $0x2f8] sm:$0xff] }
  0x17   :  { %321 = vmatpush.msra.mxu0 %v176_v0  ;;  %380 = vmatpush.msra.mxu3 %v225_v12  ;;  %v249_v52 = vld [vmem:[%s1112_s3 + $0x270] sm:$0xff]  ;;  %v220_v55 = vld [vmem:[%s1112_s3 + $0x188] sm:$0xff]  ;;  %v219_v0 = vld [vmem:[%s1112_s3 + $0x180] sm:$0xff]  ;;  %v93_v12 = vshrl.u32 %v85_v58, 15  ;;  %v103_v26 = vmul.u32 2221713035, %v892_v10 }
  0x18   :  { %341 = vmatpush.msra.mxu1 %v192_v3  ;;  %362 = vmatpush.msra.mxu2 %v207_v6  ;;  %v280_v59 = vld [vmem:[%s1112_s3 + $0x368] sm:$0xff]  ;;  %v265_v63 = vld [vmem:[%s1112_s3 + $0x2f0] sm:$0xff]  ;;  %v279_v3 = vld [vmem:[%s1112_s3 + $0x360] sm:$0xff]  ;;  %v102_v6 = vmul.u32 2221713035, %v848_v53 }
  0x19   :  { %322 = vmatpush.msra.mxu0 %v175_v7  ;;  %381 = vmatpush.msra.mxu3 %v224_v16  ;;  %v248_v60 = vld [vmem:[%s1112_s3 + $0x268] sm:$0xff]  ;;  %v247_v4 = vld [vmem:[%s1112_s3 + $0x260] sm:$0xff]  ;;  %v278_v13 = vld [vmem:[%s1112_s3 + $0x358] sm:$0xff] }
  0x1a   :  { %342 = vmatpush.msra.mxu1 %v191_v11  ;;  %363 = vmatpush.msra.mxu2 %v206_v15  ;;  %v25_v5 = vld [vmem:[%s1110_s1] sm:$0xff]  ;;  %v264_v7 = vld [vmem:[%s1112_s3 + $0x2e8] sm:$0xff]  ;;  %v82_v11 = vmul.u32 2146121005, %v856_v57  ;;  %v246_v14 = vld [vmem:[%s1112_s3 + $0x258] sm:$0xff] }
  0x1b   :  { %323 = vmatpush.msra.mxu0 %v174_v17  ;;  %382 = vmatpush.msra.mxu3 %v223_v29  ;;  %v295_v8 = vld [vmem:[%s1112_s3 + $0x3e0] sm:$0xff]  ;;  %v27_v9 = vmax.f32 %v25_v5, 0.0  ;;  %v105_v15 = vmul.u32 2221713035, %v865_v61  ;;  %v83_v17 = vmul.u32 2146121005, %v867_v62  ;;  %v927_v29 = vxor.u32 %v93_v12, %v85_v58 }
  0x1c   :  { %343 = vmatpush.msra.mxu1 %v190_v20  ;;  %364 = vmatpush.msra.mxu2 %v205_v22  ;;  %v263_v18 = vld [vmem:[%s1112_s3 + $0x2e0] sm:$0xff]  ;;  %v294_v19 = vld [vmem:[%s1112_s3 + $0x3d8] sm:$0xff]  ;;  %v909_v20 = vxor.u32 %v92_v2, %v84_v50  ;;  %v277_v16 = vld [vmem:[%s1112_s3 + $0x350] sm:$0xff]  ;;  %v112_v22 = vshrl.u32 %v104_v1, 16 }
  0x1d   :  { %324 = vmatpush.msra.mxu0 %v173_v23  ;;  %383 = vmatpush.msra.mxu3 %v222_v25  ;;  %144 = vst [vmem:[#allocation1] ss:$4 sm:$0xff] %v27_v9  ;;  %v245_v21 = vld [vmem:[%s1112_s3 + $0x250] sm:$0xff]  ;;  %v262_v23 = vld [vmem:[%s1112_s3 + $0x2d8] sm:$0xff]  ;;  %v26_v27 = vld [vmem:[%s1110_s1 + $0x8] sm:$0xff]  ;;  %v91_v35 = vshrl.u32 %v83_v17, 15 }
  0x1e   :  { %344 = vmatpush.msra.mxu1 %v189_v28  ;;  %365 = vmatpush.msra.mxu2 %v204_v32  ;;  %v293_v24 = vld [vmem:[%s1112_s3 + $0x3d0] sm:$0xff]  ;;  %v90_v28 = vshrl.u32 %v82_v11, 15  ;;  %v276_v30 = vld [vmem:[%s1112_s3 + $0x348] sm:$0xff]  ;;  %v110_v32 = vshrl.u32 %v102_v6, 16  ;;  %v28_v34 = vmax.f32 %v26_v27, 0.0  ;;  %v120_v40 = vxor.u32 %v112_v22, %v104_v1  ;;  %v291_v42 = vld [vmem:[%s1112_s3 + $0x3c0] sm:$0xff] }
  0x1f   :  { %325 = vmatpush.msra.mxu0 %v172_v33  ;;  %384 = vmatpush.msra.mxu3 %v221_v48  ;;  %v244_v31 = vld [vmem:[%s1112_s3 + $0x248] sm:$0xff]  ;;  %v113_v33 = vshrl.u32 %v105_v15, 16  ;;  %v108_v37 = vmul.u32 2221713035, %v909_v20 }
  0x20   :  { %345 = vmatpush.msra.mxu1 %v188_v36  ;;  %366 = vmatpush.msra.mxu2 %v203_v38  ;;  %v261_v36 = vld [vmem:[%s1112_s3 + $0x2d0] sm:$0xff]  ;;  %v292_v25 = vld [vmem:[%s1112_s3 + $0x3c8] sm:$0xff]  ;;  %v275_v38 = vld [vmem:[%s1112_s3 + $0x340] sm:$0xff]  ;;  %146 = vst [vmem:[#allocation1 + $0x20] ss:$4 sm:$0xff] %v28_v34 }
  0x21   :  { %326 = vmatpush.msra.mxu0 %v171_v39  ;;  %385 = vmatpush.msra.mxu3 %v220_v55  ;;  %v243_v39 = vld [vmem:[%s1112_s3 + $0x240] sm:$0xff]  ;;  %v260_v41 = vld [vmem:[%s1112_s3 + $0x2c8] sm:$0xff] }
  0x22   :  { %431 = vmatpush.msrb.mxu2 %v282_v43  ;;  %346 = vmatpush.msra.mxu1 %v187_v47  ;;  %v956_v43 = vxor.u32 %v90_v28, %v82_v11 }
  0x23   :  { %391 = vmatpush.msrb.mxu0 %v250_v44  ;;  %386 = vmatpush.msra.mxu3 %v219_v0  ;;  %v109_v44 = vmul.u32 2221713035, %v927_v29 }
  0x24   :  { %432 = vmatpush.msrb.mxu2 %v281_v51  ;;  %411 = vmatpush.msrb.mxu1 %v266_v54 }
  0x25   :  { %392 = vmatpush.msrb.mxu0 %v249_v52  ;;  %454 = vmatpush.msrb.mxu3 %v295_v8 }
  0x26   :  { %433 = vmatpush.msrb.mxu2 %v280_v59  ;;  %412 = vmatpush.msrb.mxu1 %v265_v63 }
  0x27   :  { %393 = vmatpush.msrb.mxu0 %v248_v60  ;;  %455 = vmatpush.msrb.mxu3 %v294_v19 }
  0x28   :  { %434 = vmatpush.msrb.mxu2 %v279_v3  ;;  %413 = vmatpush.msrb.mxu1 %v264_v7 }
  0x29   :  { %394 = vmatpush.msrb.mxu0 %v247_v4  ;;  %456 = vmatpush.msrb.mxu3 %v293_v24 }
  0x2a   :  { %435 = vmatpush.msrb.mxu2 %v278_v13  ;;  %414 = vmatpush.msrb.mxu1 %v263_v18 }
  0x2b   :  { %395 = vmatpush.msrb.mxu0 %v246_v14 }
  0x2c   :  { %436 = vmatpush.msrb.mxu2 %v277_v16  ;;  %415 = vmatpush.msrb.mxu1 %v262_v23 }
  0x2d   :  { %396 = vmatpush.msrb.mxu0 %v245_v21 }
  0x2e   :  { %437 = vmatpush.msrb.mxu2 %v276_v30 }
  0x2f   :  { %397 = vmatpush.msrb.mxu0 %v244_v31 }
  0x30   :  { %12 = vsyncpa [#allocation4], 0  ;;  %416 = vmatpush.msrb.mxu1 %v261_v36  ;;  %457 = vmatpush.msrb.mxu3 %v292_v25  ;;  %v274_v45 = vld [vmem:[%s1112_s3 + $0x338] sm:$0xff]  ;;  %v118_v47 = vxor.u32 %v110_v32, %v102_v6  ;;  %v121_v48 = vxor.u32 %v113_v33, %v105_v15  ;;  %v111_v49 = vshrl.u32 %v103_v26, 16  ;;  %v967_v50 = vxor.u32 %v91_v35, %v83_v17  ;;  %v259_v51 = vld [vmem:[%s1112_s3 + $0x2c0] sm:$0xff]  ;;  %s509_s30 = sshll.u32 %s1115_s6, 4  ;;  %s510_s30 = int_to_ptr.hbm [resolvable:$true] %s509_s30 }
  0x31   :  { %v242_v46 = vld [vmem:[%s1112_s3 + $0x238] sm:$0xff]  ;;  %438 = vmatpush.msrb.mxu2 %v275_v38  ;;  %398 = vmatpush.msrb.mxu0 %v243_v39  ;;  %v273_v53 = vld [vmem:[%s1112_s3 + $0x330] sm:$0xff]  ;;  %v128_v55 = vshrl.u32 %v120_v40, 8  ;;  %v116_v58 = vshrl.u32 %v108_v37, 16  ;;  %v106_v59 = vmul.u32 2221713035, %v956_v43 }
  0x32   :  { %v290_v52 = vld [vmem:[%s1112_s3 + $0x3b8] sm:$0xff]  ;;  %417 = vmatpush.msrb.mxu1 %v260_v41  ;;  %458 = vmatpush.msrb.mxu3 %v291_v42  ;;  %v241_v54 = vld [vmem:[%s1112_s3 + $0x230] sm:$0xff]  ;;  %v117_v60 = vshrl.u32 %v109_v44, 16  ;;  %v272_v61 = vld [vmem:[%s1112_s3 + $0x328] sm:$0xff]  ;;  %v126_v63 = vshrl.u32 %v118_v47, 8  ;;  %v129_v0 = vshrl.u32 %v121_v48, 8  ;;  %v119_v1 = vxor.u32 %v111_v49, %v103_v26 }
  0x33   :  { %439 = vmatpush.msrb.mxu2 %v274_v45  ;;  %399 = vmatpush.msrb.mxu0 %v242_v46  ;;  %v258_v56 = vld [vmem:[%s1112_s3 + $0x2b8] sm:$0xff]  ;;  %v289_v57 = vld [vmem:[%s1112_s3 + $0x3b0] sm:$0xff]  ;;  %v240_v62 = vld [vmem:[%s1112_s3 + $0x228] sm:$0xff]  ;;  %v107_v2 = vmul.u32 2221713035, %v967_v50  ;;  %vm1007_vm0 = vcmp.lt.s32.totalorder %v128_v55, 8388608  ;;  %v124_v10 = vxor.u32 %v116_v58, %v108_v37 }
  0x34   :  { %418 = vmatpush.msrb.mxu1 %v259_v51  ;;  %459 = vmatpush.msrb.mxu3 %v290_v52  ;;  %v257_v3 = vld [vmem:[%s1112_s3 + $0x2b0] sm:$0xff]  ;;  %v288_v4 = vld [vmem:[%s1112_s3 + $0x3a8] sm:$0xff]  ;;  %v271_v5 = vld [vmem:[%s1112_s3 + $0x320] sm:$0xff]  ;;  %v114_v11 = vshrl.u32 %v106_v59, 16  ;;  %v125_v12 = vxor.u32 %v117_v60, %v109_v44  ;;  %vm1020_vm1 = vcmp.lt.s32.totalorder %v126_v63, 8388608  ;;  %vm1024_vm2 = vcmp.lt.s32.totalorder %v129_v0, 8388608 }
  0x35   :  { %440 = vmatpush.msrb.mxu2 %v273_v53  ;;  %400 = vmatpush.msrb.mxu0 %v241_v54  ;;  %v239_v6 = vld [vmem:[%s1112_s3 + $0x220] sm:$0xff]  ;;  %v149_v8 = vld.sshfl [vmem:[#allocation1 + $0x10] sm:$0xff pattern:$0x73625140]  ;;  %v256_v9 = vld [vmem:[%s1112_s3 + $0x2a8] sm:$0xff]  ;;  %v127_v18 = vshrl.u32 %v119_v1, 8 }
  0x36   :  { %419 = vmatpush.msrb.mxu1 %v258_v56  ;;  %460 = vmatpush.msrb.mxu3 %v289_v57  ;;  %v270_v13 = vld [vmem:[%s1112_s3 + $0x318] sm:$0xff]  ;;  %v287_v14 = vld [vmem:[%s1112_s3 + $0x3a0] sm:$0xff]  ;;  %v115_v19 = vshrl.u32 %v107_v2, 16  ;;  %v269_v23 = vld [vmem:[%s1112_s3 + $0x310] sm:$0xff]  ;;  %v132_v26 = vshrl.u32 %v124_v10, 8  ;;  %v122_v27 = vxor.u32 %v114_v11, %v106_v59  ;;  %v133_v28 = vshrl.u32 %v125_v12, 8 }
  0x37   :  { %441 = vmatpush.msrb.mxu2 %v272_v61  ;;  %401 = vmatpush.msrb.mxu0 %v240_v62  ;;  %v147_v20 = vld.sshfl [vmem:[#allocation1] sm:$0xff pattern:$0x73625140]  ;;  %v150_v16 = vld.sshfl [vmem:[#allocation1 + $0x18] sm:$0xff pattern:$0x73625140] }
  0x38   :  { %420 = vmatpush.msrb.mxu1 %v257_v3  ;;  %461 = vmatpush.msrb.mxu3 %v288_v4  ;;  %v238_v21 = vld [vmem:[%s1112_s3 + $0x218] sm:$0xff]  ;;  %v255_v22 = vld [vmem:[%s1112_s3 + $0x2a0] sm:$0xff]  ;;  %vm135_vm3 = vcmp.lt.s32.totalorder %v127_v18, 8388608  ;;  %v148_v29 = vld.sshfl [vmem:[#allocation1 + $0x8] sm:$0xff pattern:$0x73625140]  ;;  %v123_v33 = vxor.u32 %v115_v19, %v107_v2 }
  0x39   :  { %442 = vmatpush.msrb.mxu2 %v271_v5  ;;  %402 = vmatpush.msrb.mxu0 %v239_v6  ;;  %v286_v24 = vld [vmem:[%s1112_s3 + $0x398] sm:$0xff]  ;;  %v237_v30 = vld [vmem:[%s1112_s3 + $0x210] sm:$0xff]  ;;  %v268_v32 = vld [vmem:[%s1112_s3 + $0x308] sm:$0xff]  ;;  %vm1070_vm4 = vcmp.lt.s32.totalorder %v132_v26, 8388608  ;;  %v130_v39 = vshrl.u32 %v122_v27, 8  ;;  %vm1074_vm5 = vcmp.lt.s32.totalorder %v133_v28, 8388608 }
  0x3a   :  { %520 = vmatmul.msk.f32.vlgmr.msra.gmra.mxu2 %vm1007_vm0, %v149_v8  ;;  %421 = vmatpush.msrb.mxu1 %v256_v9  ;;  %v254_v31 = vld [vmem:[%s1112_s3 + $0x298] sm:$0xff]  ;;  %v285_v34 = vld [vmem:[%s1112_s3 + $0x390] sm:$0xff]  ;;  %v236_v35 = vld [vmem:[%s1112_s3 + $0x208] sm:$0xff]  ;;  %v131_v45 = vshrl.u32 %v123_v33, 8  ;;  %vm307_vm7 = vcmask 850944   ;;  %v561_v51 = vmov 0  }
  0x3b   :  { %443 = vmatpush.msrb.mxu2 %v270_v13  ;;  %462 = vmatpush.msrb.mxu3 %v287_v14  ;;  %v253_v36 = vld [vmem:[%s1112_s3 + $0x290] sm:$0xff]  ;;  %v267_v25 = vld [vmem:[%s1112_s3 + $0x300] sm:$0xff]  ;;  %v284_v37 = vld [vmem:[%s1112_s3 + $0x388] sm:$0xff]  ;;  %vm138_vm6 = vcmp.lt.s32.totalorder %v130_v39, 8388608  ;;  %vm476_vm9 = vcmask 74752  }
  0x3c   :  { %518 = vmatmul.msk.f32.vlgmr.msra.gmra.mxu0 %vm1020_vm1, %v147_v20  ;;  %521 = vmatmul.msk.f32.vlgmr.msra.gmra.mxu3 %vm1024_vm2, %v150_v16  ;;  %v153_v41 = vld.sshfl [vmem:[#allocation1 + $0x30] sm:$0xff pattern:$0x73625140]  ;;  %v154_v42 = vld.sshfl [vmem:[#allocation1 + $0x38] sm:$0xff pattern:$0x73625140] }
  0x3d   :  { %403 = vmatpush.msrb.mxu0 %v238_v21  ;;  %422 = vmatpush.msrb.mxu1 %v255_v22  ;;  %v235_v43 = vld [vmem:[%s1112_s3 + $0x200] sm:$0xff]  ;;  %v252_v44 = vld [vmem:[%s1112_s3 + $0x288] sm:$0xff]  ;;  %v170_v48 = vsel %vm1074_vm5, %v154_v42, 0.0  ;;  %vm139_vm8 = vcmp.lt.s32.totalorder %v131_v45, 8388608 }
  0x3e   :  { %444 = vmatpush.msrb.mxu2 %v269_v23  ;;  %463 = vmatpush.msrb.mxu3 %v286_v24  ;;  %v283_v46 = vld [vmem:[%s1112_s3 + $0x380] sm:$0xff]  ;;  %v152_v52 = vld.sshfl [vmem:[#allocation1 + $0x28] sm:$0xff pattern:$0x73625140] }
  0x3f   :  { %519 = vmatmul.msk.f32.vlgmr.msra.gmra.mxu1 %vm135_vm3, %v148_v29  ;;  %404 = vmatpush.msrb.mxu0 %v237_v30  ;;  %v151_v47 = vld.sshfl [vmem:[#allocation1 + $0x20] sm:$0xff pattern:$0x73625140] }
  0x40   :  { %423 = vmatpush.msrb.mxu1 %v254_v31  ;;  %445 = vmatpush.msrb.mxu2 %v268_v32  ;;  %v296_v49 = vld [vmem:[%s1111_s2] sm:$0x3] }
  0x41   :  { %464 = vmatpush.msrb.mxu3 %v285_v34  ;;  %405 = vmatpush.msrb.mxu0 %v236_v35  ;;  %v251_v50 = vld [vmem:[%s1112_s3 + $0x280] sm:$0xff] }
  0x42   :  { %424 = vmatpush.msrb.mxu1 %v253_v36  ;;  %446 = vmatpush.msrb.mxu2 %v267_v25  ;;  %v529_v53 = vld [vmem:[%s1113_s4] ss:$0 sm:$0xff]  ;;  %s562_s4 = smov [#allocation3]  }
  0x43   :  { %465 = vmatpush.msrb.mxu3 %v284_v37  ;;  %524 = vmatmul.msk.f32.vlgmr.msrb.gmra.mxu2 %vm1070_vm4, %v153_v41  ;;  %v530_v6 = vld [vmem:[%s1114_s5] ss:$0 sm:$0xff]  ;;  %s507_s5 = sshll.u32 %s562_s4, 4  ;;  %s508_s5 = int_to_ptr.vmem [resolvable:$true] %s507_s5 }
  0x44   :  { %406 = vmatpush.msrb.mxu0 %v235_v43  ;;  %425 = vmatpush.msrb.mxu1 %v252_v44 }
  0x45   :  { %466 = vmatpush.msrb.mxu3 %v283_v46  ;;  %528 = vset.pattern.permute.xlu0 %v561_v51 }
  0x46   :  { %522 = vmatmul.msk.f32.vlgmr.msrb.gmra.mxu0 %vm138_vm6, %v151_v47  ;;  %525 = vmatmul.msk.f32.vlgmr.msrb.gmra.mxu3 %vm307_vm7, %v170_v48 }
  0x47   :  { %300 = vperm.xlu0 %528, %v296_v49   ;;  %426 = vmatpush.msrb.mxu1 %v251_v50 }
  0x48   :  { %523 = vmatmul.msk.f32.vlgmr.msrb.gmra.mxu1 %vm139_vm8, %v152_v52 }
  0xb9   :  { %v301_v54 = vpop.permute.xlu0 %300  ;;  %v328_v55 = vpop.f32.mrf.mxu0 }
  0xba   :  { %v306_v56 = vmul.f32 %v529_v53, %v301_v54 }
  0xbc   :  { %v329_v57 = vadd.f32 %v328_v55, %v306_v56  ;;  %v348_v58 = vpop.f32.mrf.mxu1 }
  0xbd   :  { %v368_v59 = vpop.f32.mrf.mxu2 }
  0xbe   :  { %v349_v60 = vadd.f32 %v348_v58, %v329_v57 }
  0xbf   :  { %v388_v61 = vpop.f32.mrf.mxu3 }
  0xc0   :  { %v369_v62 = vadd.f32 %v368_v59, %v349_v60 }
  0xc2   :  { %v389_v63 = vadd.f32 %v388_v61, %v369_v62 }
  0xc3   :  { %v408_v0 = vpop.f32.mrf.mxu0 }
  0xc4   :  { %v409_v1 = vadd.f32 %v408_v0, %v389_v63 }
  0xc5   :  { %v428_v2 = vpop.f32.mrf.mxu1 }
  0xc6   :  { %v429_v3 = vadd.f32 %v428_v2, %v409_v1  ;;  %v448_v4 = vpop.f32.mrf.mxu2 }
  0xc8   :  { %v449_v5 = vadd.f32 %v448_v4, %v429_v3 }
  0xc9   :  { %v468_v7 = vpop.f32.mrf.mxu3 }
  0xca   :  { %v469_v8 = vadd.f32 %v468_v7, %v449_v5 }
  0xcc   :  { %v475_v9 = vadd.f32 %v530_v6, %v469_v8 }
  0xce   :  { %v477_v10 = vsel %vm476_vm9, %v475_v9, -inf }
  0xcf   :  { %478 = vmax.xlane.f32.xlu0 %v477_v10 }
 0x142   :  { %v479_v11 = vpop.xlane.xlu0 %478 }
 0x143   :  { %v480_v12 = vsub.f32 %v475_v9, %v479_v11 }
 0x145   :  { %v481_v13 = vmul.f32 1.442695, %v480_v12 }
 0x147   :  { %531 = vpow2.f32 %v481_v13 }
 0x14d   :  { %v532_v14 = vpop.eup %531 }
 0x14e   :  { %v483_v15 = vsel %vm476_vm9, %v532_v14, 0.0 }
 0x14f   :  { %484 = vadd.xlane.f32.xlu1 %v483_v15 }
 0x1c2   :  { %v485_v17 = vpop.xlane.xlu1 %484 }
 0x1c3   :  { %533 = vrcp.f32 %v485_v17  ;;  %v497_v16 = vand.u32 2147483648, %v485_v17  ;;  %v495_v22 = vand.u32 2147483647, %v485_v17  ;;  %vm491_vm11 = vweird.f32 %v485_v17 }
 0x1c5   :  { %v498_v24 = vor.u32 1.1754944e-38, %v497_v16  ;;  %vm496_vm13 = vcmp.eq.f32.partialorder %v495_v22, 8.507059e+37 }
 0x1c9   :  { %v534_v18 = vpop.eup %533 }
 0x1ca   :  { %v487_v19 = vmul.f32 %v534_v18, %v485_v17  ;;  %vm492_vm10 = vweird.f32 %v534_v18 }
 0x1cb   :  { %vm493_vm12 = vmor %vm491_vm11, %vm492_vm10 }
 0x1cc   :  { %v488_v20 = vsub.f32 1.0, %v487_v19 }
 0x1ce   :  { %v489_v21 = vmul.f32 %v534_v18, %v488_v20 }
 0x1d0   :  { %v490_v23 = vadd.f32 %v534_v18, %v489_v21 }
 0x1d2   :  { %v494_v26 = vsel %vm493_vm12, %v534_v18, %v490_v23 }
 0x1d3   :  { %v499_v27 = vsel %vm496_vm13, %v498_v24, %v494_v26 }
 0x1d4   :  { %v500_v28 = vmul.f32 %v532_v14, %v499_v27 }
 0x1d6   :  { %501 = vst.msk [vmem:[#allocation3] sm:$0x3] %vm476_vm9, %v500_v28 }
 0x1d7   :  { %512 = dma.vmem_to_hbm [thread:$0]  %s508_s5, 32, %s510_s30, [#allocation4]  }
 0x1d8   :  { %559 = dma.done.wait [#allocation4], 32  }
 0x1d9   :  { %560 = vsyncadd [#allocation4], 4294967264 }
 0x1da   :  { %517 = vsyncpa [#allocation4], 1 }

</bundles_post_ra>
